<compile_context>
chip_gen: v7x
topology: tpu7x:2x2x1
jax: 0.10.0
libtpu: 0.0.40
codegen_flags: <defaults>
</compile_context>

<pallas_src>
import jax
import jax.numpy as jnp
from jax.experimental import pallas as pl
from jax.experimental.pallas import tpu as pltpu


def _mlp_kernel(xT_ref,
                w1t_ref, b1_ref,
                w2t_ref, b2_ref,
                w3t_ref, b3_ref,
                o_ref):
    # xT_ref: (D_in, tile_n) -- node axis on lanes.
    x = xT_ref[...]

    # fc1 (+ folded BN1) + ReLU        -> (H1, tile_n)
    h1 = jnp.dot(w1t_ref[...], x, preferred_element_type=jnp.float32)
    h1 = jnp.maximum(h1 + b1_ref[...], 0.0)

    # dropout (eval mode) == identity

    # fc2 (+ folded BN2) + ReLU        -> (H2, tile_n)
    h2 = jnp.dot(w2t_ref[...], h1, preferred_element_type=jnp.float32)
    h2 = jnp.maximum(h2 + b2_ref[...], 0.0)

    # fc3 (logits)                     -> (D_out, tile_n)
    o_ref[...] = (jnp.dot(w3t_ref[...], h2,
                          preferred_element_type=jnp.float32)
                  + b3_ref[...]).astype(o_ref.dtype)


def node_classifier_ppi_forward(x, params, *, tile_n=1024, eps=1e-5):
    """Eval-mode forward of NodeClassifier_PPI as one fused Pallas kernel.

    x: [N, D_in] float32 node embeddings (N may be any size; padded internally).
    Returns logits [N, D_out] float32.
    """
    N, d_in = x.shape
    w1, b1, g1, be1, rm1, rv1 = (params[k] for k in
                                 ("w1", "b1", "gamma1", "beta1", "rmean1", "rvar1"))
    w2, b2, g2, be2, rm2, rv2 = (params[k] for k in
                                 ("w2", "b2", "gamma2", "beta2", "rmean2", "rvar2"))
    w3, b3 = params["w3"], params["b3"]
    h1, h2, d_out = w1.shape[1], w2.shape[1], w3.shape[1]

    # ---- Fold inference-mode BatchNorm into the linear layers --------------
    #   bn(z) = z * s + t,  s = gamma/sqrt(rvar+eps),  t = beta - rmean*s
    #   => (x @ W + b)*s + t  ==  x @ (W*s) + (b*s + t)
    s1 = g1 / jnp.sqrt(rv1 + eps)
    t1 = be1 - rm1 * s1
    s2 = g2 / jnp.sqrt(rv2 + eps)
    t2 = be2 - rm2 * s2

    f32 = jnp.float32
    w1t = (w1 * s1[None, :]).T.astype(f32)          # (H1, D_in)
    b1c = (b1 * s1 + t1).reshape(-1, 1).astype(f32)  # (H1, 1)
    w2t = (w2 * s2[None, :]).T.astype(f32)          # (H2, H1)
    b2c = (b2 * s2 + t2).reshape(-1, 1).astype(f32)  # (H2, 1)
    w3t = w3.T.astype(f32)                          # (D_out, H2)
    b3c = b3.reshape(-1, 1).astype(f32)             # (D_out, 1)

    # ---- Pad node axis so it is a multiple of a lane-aligned tile ----------
    assert tile_n % 128 == 0, "tile_n must be a multiple of 128 (lane width)"
    n_align = ((N + 127) // 128) * 128
    tile_n = min(tile_n, n_align)
    n_pad = ((n_align + tile_n - 1) // tile_n) * tile_n

    xT = jnp.pad(x.T.astype(f32), ((0, 0), (0, n_pad - N)))   # (D_in, n_pad)

    grid = (n_pad // tile_n,)
    full = lambda shape: pl.BlockSpec(shape, lambda i: (0, 0))

    out_T = pl.pallas_call(
        _mlp_kernel,
        out_shape=jax.ShapeDtypeStruct((d_out, n_pad), f32),
        grid=grid,
        in_specs=[
            pl.BlockSpec((d_in, tile_n), lambda i: (0, i)),   # x^T tile
            full((h1, d_in)), full((h1, 1)),
            full((h2, h1)),   full((h2, 1)),
            full((d_out, h2)), full((d_out, 1)),
        ],
        out_specs=pl.BlockSpec((d_out, tile_n), lambda i: (0, i)),
        compiler_params=pltpu.CompilerParams(
            dimension_semantics=("parallel",)),
    )(xT, w1t, b1c, w2t, b2c, w3t, b3c)

    return out_T.T[:N]                                         # (N, D_out)


def _reference_forward(x, params, eps=1e-5):
    """Pure-JAX reference (eval-mode) for correctness checking."""
    def bn(z, g, b, rm, rv):
        return (z - rm) / jnp.sqrt(rv + eps) * g + b
    h = jnp.maximum(bn(x @ params["w1"] + params["b1"],
                       params["gamma1"], params["beta1"],
                       params["rmean1"], params["rvar1"]), 0.0)
    h = jnp.maximum(bn(h @ params["w2"] + params["b2"],
                       params["gamma2"], params["beta2"],
                       params["rmean2"], params["rvar2"]), 0.0)
    return h @ params["w3"] + params["b3"]


def init_params(key, input_dim, output_dim, hidden_dim1=32, hidden_dim2=16):
    ks = jax.random.split(key, 8)

    def lin(kw, kb, fan_in, fan_out):
        bound = 1.0 / jnp.sqrt(fan_in)
        w = jax.random.uniform(kw, (fan_in, fan_out), jnp.float32, -bound, bound)
        b = jax.random.uniform(kb, (fan_out,), jnp.float32, -bound, bound)
        return w, b

    w1, b1 = lin(ks[0], ks[1], input_dim, hidden_dim1)
    w2, b2 = lin(ks[2], ks[3], hidden_dim1, hidden_dim2)
    w3, b3 = lin(ks[4], ks[5], hidden_dim2, output_dim)
    # BatchNorm params: gamma=1, beta=0; deterministic non-trivial running stats.
    rmean1 = 0.1 * jax.random.normal(ks[6], (hidden_dim1,), jnp.float32)
    rvar1 = jnp.abs(1.0 + 0.1 * jax.random.normal(ks[7], (hidden_dim1,), jnp.float32))
    rmean2 = jnp.zeros((hidden_dim2,), jnp.float32)
    rvar2 = jnp.ones((hidden_dim2,), jnp.float32)
    return dict(
        w1=w1, b1=b1, gamma1=jnp.ones((hidden_dim1,), jnp.float32),
        beta1=jnp.zeros((hidden_dim1,), jnp.float32), rmean1=rmean1, rvar1=rvar1,
        w2=w2, b2=b2, gamma2=jnp.ones((hidden_dim2,), jnp.float32),
        beta2=jnp.zeros((hidden_dim2,), jnp.float32), rmean2=rmean2, rvar2=rvar2,
        w3=w3, b3=b3,
    )


if __name__ == "__main__":
    key = jax.random.PRNGKey(0)
    k_param, k_x = jax.random.split(key)

    N, INPUT_DIM, OUTPUT_DIM = 256, 64, 8     # small PPI-like node-feature shapes
    params = init_params(k_param, INPUT_DIM, OUTPUT_DIM)
    x = jax.random.normal(k_x, (N, INPUT_DIM), jnp.float32)

    # Aligned case.
    logits = node_classifier_ppi_forward(x, params)
    logits = jax.block_until_ready(logits)
    ref = _reference_forward(x, params)
    assert logits.shape == (N, OUTPUT_DIM)
    assert jnp.allclose(logits, ref, atol=1e-4, rtol=1e-4)

    # Ragged node count (exercises padding / masked tail handling).
    N2 = 200
    x2 = x[:N2]
    logits2 = jax.block_until_ready(node_classifier_ppi_forward(x2, params))
    ref2 = _reference_forward(x2, params)
    assert logits2.shape == (N2, OUTPUT_DIM)
    assert jnp.allclose(logits2, ref2, atol=1e-4, rtol=1e-4)

    print("KERNEL_OK")
</pallas_src>

<mosaic_0001>
module attributes {stable_mosaic.version = 11 : i64} {
  func.func @_mlp_kernel(%arg0: i32, %arg1: memref<64x256xf32, #tpu.memory_space<vmem>>, %arg2: memref<32x64xf32, #tpu.memory_space<vmem>>, %arg3: memref<32x1xf32, #tpu.memory_space<vmem>>, %arg4: memref<16x32xf32, #tpu.memory_space<vmem>>, %arg5: memref<16x1xf32, #tpu.memory_space<vmem>>, %arg6: memref<8x16xf32, #tpu.memory_space<vmem>>, %arg7: memref<8x1xf32, #tpu.memory_space<vmem>>, %arg8: memref<8x256xf32, #tpu.memory_space<vmem>>) attributes {dimension_semantics = [#tpu.dimension_semantics<parallel>], iteration_bounds = array<i64: 1>, scalar_prefetch = 0 : i64, scratch_operands = 0 : i64, tpu.core_type = #tpu.core_type<tc>, window_params = [{transform_indices = @transform_0, window_bounds = array<i64: 64, 256>}, {pipeline_mode = #tpu.pipeline_mode<synchronous>, transform_indices = @transform_1, window_bounds = array<i64: 32, 64>}, {pipeline_mode = #tpu.pipeline_mode<synchronous>, transform_indices = @transform_2, window_bounds = array<i64: 32, 1>}, {pipeline_mode = #tpu.pipeline_mode<synchronous>, transform_indices = @transform_3, window_bounds = array<i64: 16, 32>}, {pipeline_mode = #tpu.pipeline_mode<synchronous>, transform_indices = @transform_4, window_bounds = array<i64: 16, 1>}, {pipeline_mode = #tpu.pipeline_mode<synchronous>, transform_indices = @transform_5, window_bounds = array<i64: 8, 16>}, {pipeline_mode = #tpu.pipeline_mode<synchronous>, transform_indices = @transform_6, window_bounds = array<i64: 8, 1>}, {transform_indices = @transform_7, window_bounds = array<i64: 8, 256>}]} {
    %c0 = arith.constant 0 : index
    %c0_0 = arith.constant 0 : index
    %0 = vector.load %arg1[%c0, %c0_0] : memref<64x256xf32, #tpu.memory_space<vmem>>, vector<64x256xf32>
    %c0_1 = arith.constant 0 : index
    %c0_2 = arith.constant 0 : index
    %1 = vector.load %arg2[%c0_1, %c0_2] : memref<32x64xf32, #tpu.memory_space<vmem>>, vector<32x64xf32>
    %cst = arith.constant dense<0.000000e+00> : vector<32x256xf32>
    %2 = tpu.matmul %1, %0, %cst {dimension_numbers = #tpu.dot_dimension_numbers<[1], [0], [0], [1], [0, 0, 1, 1], [], []>} : vector<32x64xf32>, vector<64x256xf32>, vector<32x256xf32> -> vector<32x256xf32>
    %c0_3 = arith.constant 0 : index
    %c0_4 = arith.constant 0 : index
    %3 = vector.load %arg3[%c0_3, %c0_4] : memref<32x1xf32, #tpu.memory_space<vmem>>, vector<32x1xf32>
    %4 = vector.broadcast %3 : vector<32x1xf32> to vector<32x256xf32>
    %5 = arith.addf %2, %4 : vector<32x256xf32>
    %cst_5 = arith.constant 0.000000e+00 : f32
    %6 = vector.broadcast %cst_5 : f32 to vector<32x256xf32>
    %7 = arith.maximumf %5, %6 : vector<32x256xf32>
    %c0_6 = arith.constant 0 : index
    %c0_7 = arith.constant 0 : index
    %8 = vector.load %arg4[%c0_6, %c0_7] : memref<16x32xf32, #tpu.memory_space<vmem>>, vector<16x32xf32>
    %cst_8 = arith.constant dense<0.000000e+00> : vector<16x256xf32>
    %9 = tpu.matmul %8, %7, %cst_8 {dimension_numbers = #tpu.dot_dimension_numbers<[1], [0], [0], [1], [0, 0, 1, 1], [], []>} : vector<16x32xf32>, vector<32x256xf32>, vector<16x256xf32> -> vector<16x256xf32>
    %c0_9 = arith.constant 0 : index
    %c0_10 = arith.constant 0 : index
    %10 = vector.load %arg5[%c0_9, %c0_10] : memref<16x1xf32, #tpu.memory_space<vmem>>, vector<16x1xf32>
    %11 = vector.broadcast %10 : vector<16x1xf32> to vector<16x256xf32>
    %12 = arith.addf %9, %11 : vector<16x256xf32>
    %cst_11 = arith.constant 0.000000e+00 : f32
    %13 = vector.broadcast %cst_11 : f32 to vector<16x256xf32>
    %14 = arith.maximumf %12, %13 : vector<16x256xf32>
    %c0_12 = arith.constant 0 : index
    %c0_13 = arith.constant 0 : index
    %15 = vector.load %arg6[%c0_12, %c0_13] : memref<8x16xf32, #tpu.memory_space<vmem>>, vector<8x16xf32>
    %cst_14 = arith.constant dense<0.000000e+00> : vector<8x256xf32>
    %16 = tpu.matmul %15, %14, %cst_14 {dimension_numbers = #tpu.dot_dimension_numbers<[1], [0], [0], [1], [0, 0, 1, 1], [], []>} : vector<8x16xf32>, vector<16x256xf32>, vector<8x256xf32> -> vector<8x256xf32>
    %c0_15 = arith.constant 0 : index
    %c0_16 = arith.constant 0 : index
    %17 = vector.load %arg7[%c0_15, %c0_16] : memref<8x1xf32, #tpu.memory_space<vmem>>, vector<8x1xf32>
    %18 = vector.broadcast %17 : vector<8x1xf32> to vector<8x256xf32>
    %19 = arith.addf %16, %18 : vector<8x256xf32>
    %c0_17 = arith.constant 0 : index
    %c0_18 = arith.constant 0 : index
    %20 = vector.load %arg8[%c0_17, %c0_18] : memref<8x256xf32, #tpu.memory_space<vmem>>, vector<8x256xf32>
    tpu.vector_store %arg8[%c0_17, %c0_18], %19 {strides = array<i32>} : memref<8x256xf32, #tpu.memory_space<vmem>>, vector<8x256xf32>,
    return
  }
  func.func @transform_0(%arg0: i32) -> (i32, i32) {
    %c0_i32 = arith.constant 0 : i32
    %c0_i32_0 = arith.constant 0 : i32
    return %c0_i32, %arg0 : i32, i32
  }
  func.func @transform_1(%arg0: i32) -> (i32, i32) {
    %c0_i32 = arith.constant 0 : i32
    %c0_i32_0 = arith.constant 0 : i32
    %c0_i32_1 = arith.constant 0 : i32
    return %c0_i32, %c0_i32_0 : i32, i32
  }
  func.func @transform_2(%arg0: i32) -> (i32, i32) {
    %c0_i32 = arith.constant 0 : i32
    %c0_i32_0 = arith.constant 0 : i32
    %c0_i32_1 = arith.constant 0 : i32
    return %c0_i32, %c0_i32_0 : i32, i32
  }
  func.func @transform_3(%arg0: i32) -> (i32, i32) {
    %c0_i32 = arith.constant 0 : i32
    %c0_i32_0 = arith.constant 0 : i32
    %c0_i32_1 = arith.constant 0 : i32
    return %c0_i32, %c0_i32_0 : i32, i32
  }
  func.func @transform_4(%arg0: i32) -> (i32, i32) {
    %c0_i32 = arith.constant 0 : i32
    %c0_i32_0 = arith.constant 0 : i32
    %c0_i32_1 = arith.constant 0 : i32
    return %c0_i32, %c0_i32_0 : i32, i32
  }
  func.func @transform_5(%arg0: i32) -> (i32, i32) {
    %c0_i32 = arith.constant 0 : i32
    %c0_i32_0 = arith.constant 0 : i32
    %c0_i32_1 = arith.constant 0 : i32
    return %c0_i32, %c0_i32_0 : i32, i32
  }
  func.func @transform_6(%arg0: i32) -> (i32, i32) {
    %c0_i32 = arith.constant 0 : i32
    %c0_i32_0 = arith.constant 0 : i32
    %c0_i32_1 = arith.constant 0 : i32
    return %c0_i32, %c0_i32_0 : i32, i32
  }
  func.func @transform_7(%arg0: i32) -> (i32, i32) {
    %c0_i32 = arith.constant 0 : i32
    %c0_i32_0 = arith.constant 0 : i32
    return %c0_i32, %arg0 : i32, i32
  }
}

</mosaic_0001>

<bundles_post_ra>
// kernel: tpu_custom_call.1
= control target key start
LH: loop header
LB: loop body
LE: loop exit
PB: predicated region body
PF: predicated region fallthrough
CT: control target
= control target key end

     0   :  { %12 = vsyncpa [#allocation3], 0  ;;  %s606_s0 = inlined_call_operand.hbm [shape: f32[64,256], index: 0, kind: input, shape index: {}]   ;;  %s607_s1 = inlined_call_operand.vmem [shape: f32[32,64], index: 1, kind: input, shape index: {}]   ;;  %s608_s2 = inlined_call_operand.vmem [shape: f32[32,1], index: 2, kind: input, shape index: {}]   ;;  %s609_s3 = inlined_call_operand.vmem [shape: f32[16,32], index: 3, kind: input, shape index: {}]   ;;  %s610_s4 = inlined_call_operand.vmem [shape: f32[16,1], index: 4, kind: input, shape index: {}]   ;;  %s611_s5 = inlined_call_operand.vmem [shape: f32[8,16], index: 5, kind: input, shape index: {}]   ;;  %s612_s6 = inlined_call_operand.vmem [shape: f32[8,1], index: 6, kind: input, shape index: {}]   ;;  %s613_s7 = inlined_call_operand.hbm [shape: f32[8,256], index: 7, kind: output, shape index: {}]  }
   0x1   :  { %13 = vsyncpa [#allocation4], 0  ;;  %s487_s24 = smov [#allocation2]   ;;  %s439_s28 = scalar_lea.hbm %s606_s0, 2048 }
   0x2   :  { %s19_s25 = sshll.u32 %s487_s24, 4  ;;  %p440_p0 = scmp.ne.s32.totalorder %s606_s0, %s439_s28  ;;  %s20_s25 = int_to_ptr.vmem [resolvable:$true] %s19_s25 }
   0x3   :  { %p443_p1 = scmp.lt.u32.totalorder %s439_s28, %s606_s0 }
   0x5   :  { %p445_p2 = pnand %p443_p1, %p440_p0 }
   0x7   :  { %448 = shalt.err (!%p445_p2)
}
   0x8   :  { %s449_s10 = scalar_lea.vmem %s20_s25, 2048  ;;  %p454_p4 = scmp.lt.s32.totalorder %s20_s25, %s20_s25 }
   0x9   :  { %p450_p3 = scmp.ne.s32.totalorder %s20_s25, %s449_s10  ;;  %p455_p5 = scmp.lt.s32.totalorder %s449_s10, %s449_s10 }
   0xb   :  { %p456_p6 = por %p455_p5, %p454_p4 }
   0xd   :  { %p457_p7 = pnand %p456_p6, %p450_p3 }
   0xf   :  { %460 = shalt.err (!%p457_p7)
}
  0x10   :  { %s488_s11 = smov 256   ;;  %s489_s12 = smov 16  }
  0x11   :  { %25 = dma.hbm_to_vmem [thread:$0]  %s606_s0, 2048, %s20_s25, [#allocation3], %s488_s11, %s488_s11, %s489_s12  }
  0x12   :  { %483 = dma.done.wait [#allocation3], 2048  }
  0x13   :  { %484 = vsyncadd [#allocation3], 4294965248  ;;  %v490_v0 = vmov 0.0   ;;  %v491_v1 = vmov 0   ;;  %v42_v2 = vld [vmem:[#allocation2 + $0x8] sm:$0xff]  ;;  %v44_v3 = vld [vmem:[#allocation2 + $0x18] sm:$0xff] }
  0x14   :  { %162 = vmatprep.mubr.f32.mxu0 %v490_v0  ;;  %437 = vset.pattern.permute.xlu0 %v491_v1  ;;  %v41_v4 = vld [vmem:[#allocation2] sm:$0xff]  ;;  %v403_v5 = vpack.c.bf16 %v44_v3, %v42_v2  ;;  %v43_v6 = vld [vmem:[#allocation2 + $0x10] sm:$0xff]  ;;  %v46_v7 = vld [vmem:[#allocation2 + $0x28] sm:$0xff]  ;;  %vm85_vm0 = vcmask 523264   ;;  %vm209_vm1 = vcmask 261120   ;;  %vm304_vm2 = vcmask 130048  }
  0x15   :  { %438 = vset.pattern.permute.xlu1 %v491_v1  ;;  %280 = vmatprep.mubr.f32.mxu1 %v490_v0  ;;  %v48_v8 = vld [vmem:[#allocation2 + $0x38] sm:$0xff]  ;;  %v405_v9 = vpack.c.bf16 %v43_v6, %v41_v4  ;;  %v45_v11 = vld [vmem:[#allocation2 + $0x20] sm:$0xff]  ;;  %v47_v12 = vld [vmem:[#allocation2 + $0x30] sm:$0xff]  ;;  %s492_s14 = smov [#allocation5]  }
  0x16   :  { %v407_v10 = vpack.c.bf16 %v48_v8, %v46_v7  ;;  %v50_v13 = vld [vmem:[#allocation2 + $0x48] sm:$0xff]  ;;  %404 = vmatprep.subr.bf16.mxu0 %v403_v5  ;;  %v52_v14 = vld [vmem:[#allocation2 + $0x58] sm:$0xff]  ;;  %v409_v15 = vpack.c.bf16 %v47_v12, %v45_v11  ;;  %v49_v17 = vld [vmem:[#allocation2 + $0x40] sm:$0xff]  ;;  %s387_s0 = sshll.u32 %s492_s14, 4  ;;  %s388_s0 = int_to_ptr.vmem [resolvable:$true] %s387_s0 }
  0x17   :  { %406 = vmatpush1.bf16.msra.mxu0 %v405_v9  ;;  %v411_v16 = vpack.c.bf16 %v52_v14, %v50_v13  ;;  %v51_v18 = vld [vmem:[#allocation2 + $0x50] sm:$0xff]  ;;  %v54_v19 = vld [vmem:[#allocation2 + $0x68] sm:$0xff]  ;;  %v56_v20 = vld [vmem:[#allocation2 + $0x78] sm:$0xff]  ;;  %s461_s15 = scalar_lea.vmem %s388_s0, 256  ;;  %p466_p9 = scmp.lt.s32.totalorder %s388_s0, %s388_s0 }
  0x18   :  { %408 = vmatprep.subr.bf16.mxu0 %v407_v10  ;;  %v61_v21 = vld [vmem:[%s608_s2] sm:$0xff]  ;;  %v63_v22 = vld [vmem:[%s608_s2 + $0x10] sm:$0xff]  ;;  %v413_v23 = vpack.c.bf16 %v51_v18, %v49_v17  ;;  %v62_v24 = vld [vmem:[%s608_s2 + $0x8] sm:$0xff]  ;;  %v415_v25 = vpack.c.bf16 %v56_v20, %v54_v19  ;;  %p462_p8 = scmp.ne.s32.totalorder %s388_s0, %s461_s15  ;;  %p467_p10 = scmp.lt.s32.totalorder %s461_s15, %s461_s15 }
  0x19   :  { %67 = vperm.xlu0 %437, %v61_v21   ;;  %77 = vperm.xlu1 %438, %v63_v22   ;;  %v53_v26 = vld [vmem:[#allocation2 + $0x60] sm:$0xff]  ;;  %v55_v27 = vld [vmem:[#allocation2 + $0x70] sm:$0xff]  ;;  %v64_v28 = vld [vmem:[%s608_s2 + $0x18] sm:$0xff] }
  0x1a   :  { %v417_v29 = vpack.c.bf16 %v55_v27, %v53_v26  ;;  %v197_v30 = vld [vmem:[%s610_s4] sm:$0xff]  ;;  %v198_v31 = vld [vmem:[%s610_s4 + $0x8] sm:$0xff]  ;;  %v59_v35 = vld [vmem:[%s607_s1 + $0x10] sm:$0xff]  ;;  %p468_p11 = por %p467_p10, %p466_p9 }
  0x1b   :  { %410 = vmatpush1.bf16.msra.mxu0 %v409_v15  ;;  %v57_v32 = vld [vmem:[%s607_s1] sm:$0xff]  ;;  %v58_v34 = vld [vmem:[%s607_s1 + $0x8] sm:$0xff]  ;;  %v60_v36 = vld [vmem:[%s607_s1 + $0x18] sm:$0xff] }
  0x1c   :  { %412 = vmatprep.subr.bf16.mxu0 %v411_v16  ;;  %v298_v33 = vld [vmem:[%s612_s6] sm:$0xff]  ;;  %v196_v7 = vld [vmem:[%s609_s3 + $0x8] sm:$0xff]  ;;  %p469_p12 = pnand %p468_p11, %p462_p8 }
  0x1d   :  { %72 = vperm.xlu0 %437, %v62_v24   ;;  %82 = vperm.xlu1 %438, %v64_v28   ;;  %v195_v6 = vld [vmem:[%s609_s3] sm:$0xff] }
  0x1f   :  { %414 = vmatpush1.bf16.msra.mxu0 %v413_v23 }
  0x20   :  { %416 = vmatprep.subr.bf16.mxu0 %v415_v25 }
  0x21   :  { %201 = vperm.xlu0 %437, %v197_v30   ;;  %206 = vperm.xlu1 %438, %v198_v31  }
  0x23   :  { %418 = vmatpush1.bf16.msra.mxu0 %v417_v29 }
  0x25   :  { %301 = vperm.xlu0 %437, %v298_v33  }
  0x26   :  { %396 = vmatmul.mubr.msk.f32.vlgmr.msra.gmra.mrb[0].mxu0 %vm85_vm0, %v57_v32 }
  0x27   :  { %168 = vmatprep.mubr.f32.mxu0 %v490_v0 }
  0x2a   :  { %397 = vmatmul.mubr.msk.f32.gmra.mrb[2].mxu0 %vm85_vm0, %v58_v34 }
  0x2b   :  { %174 = vmatprep.mubr.f32.mxu0 %v490_v0 }
  0x2e   :  { %398 = vmatmul.mubr.msk.f32.gmra.mrb[4].mxu0 %vm85_vm0, %v59_v35 }
  0x2f   :  { %180 = vmatprep.mubr.f32.mxu0 %v490_v0 }
  0x32   :  { %399 = vmatmul.mubr.msk.f32.gmra.mrb[6].mxu0 %vm85_vm0, %v60_v36 }
  0x98   :  { %v68_v37 = vpop.permute.xlu0 %67  ;;  %v78_v46 = vpop.permute.xlu1 %77 }
  0x9c   :  { %v73_v41 = vpop.permute.xlu0 %72  ;;  %v83_v57 = vpop.permute.xlu1 %82 }
  0xa0   :  { %v202_v10 = vpop.permute.xlu0 %201  ;;  %v207_v12 = vpop.permute.xlu1 %206 }
  0xa4   :  { %v302_v24 = vpop.permute.xlu0 %301 }
  0xf9   :  { %v164_v38 = vpop.f32.mrb[0].mxu0 }
  0xfa   :  { %v166_v39 = vpop.f32.mrb[1].mxu0  ;;  %v165_v40 = vadd.f32 %v164_v38, %v68_v37 }
  0xfb   :  { %v167_v42 = vadd.f32 %v166_v39, %v68_v37 }
  0xfc   :  { %v187_v48 = vmax.f32 %v165_v40, 0.0 }
  0xfd   :  { %v170_v43 = vpop.f32.mrb[2].mxu0  ;;  %v188_v50 = vmax.f32 %v167_v42, 0.0 }
  0xfe   :  { %v171_v44 = vadd.f32 %v170_v43, %v73_v41  ;;  %v172_v45 = vpop.f32.mrb[3].mxu0 }
  0xff   :  { %v173_v47 = vadd.f32 %v172_v45, %v73_v41 }
 0x100   :  { %v189_v49 = vmax.f32 %v171_v44, 0.0 }
 0x101   :  { %v190_v51 = vmax.f32 %v173_v47, 0.0  ;;  %v176_v52 = vpop.f32.mrb[4].mxu0 }
 0x102   :  { %v178_v53 = vpop.f32.mrb[5].mxu0  ;;  %v421_v54 = vpack.c.bf16 %v189_v49, %v187_v48  ;;  %v177_v56 = vadd.f32 %v176_v52, %v78_v46 }
 0x103   :  { %v419_v55 = vpack.c.bf16 %v190_v51, %v188_v50  ;;  %v179_v58 = vadd.f32 %v178_v53, %v78_v46 }
 0x104   :  { %v191_v63 = vmax.f32 %v177_v56, 0.0 }
 0x105   :  { %v182_v59 = vpop.f32.mrb[6].mxu0  ;;  %420 = vmatprep.subr.bf16.mxu1 %v419_v55  ;;  %v192_v2 = vmax.f32 %v179_v58, 0.0 }
 0x106   :  { %v183_v60 = vadd.f32 %v182_v59, %v83_v57  ;;  %v184_v61 = vpop.f32.mrb[7].mxu0  ;;  %422 = vmatpush1.bf16.msra.mxu1 %v421_v54 }
 0x107   :  { %v185_v62 = vadd.f32 %v184_v61, %v83_v57 }
 0x108   :  { %v193_v1 = vmax.f32 %v183_v60, 0.0 }
 0x109   :  { %v194_v3 = vmax.f32 %v185_v62, 0.0 }
 0x10a   :  { %v425_v4 = vpack.c.bf16 %v193_v1, %v191_v63 }
 0x10b   :  { %v423_v5 = vpack.c.bf16 %v194_v3, %v192_v2 }
 0x10d   :  { %424 = vmatprep.subr.bf16.mxu1 %v423_v5 }
 0x10e   :  { %426 = vmatpush1.bf16.msra.mxu1 %v425_v4 }
 0x111   :  { %400 = vmatmul.mubr.msk.f32.vlgmr.msra.gmra.mrb[0].mxu1 %vm209_vm1, %v195_v6 }
 0x112   :  { %286 = vmatprep.mubr.f32.mxu1 %v490_v0 }
 0x115   :  { %401 = vmatmul.mubr.msk.f32.gmra.mrb[2].mxu1 %vm209_vm1, %v196_v7 }
 0x116   :  { %372 = vmatprep.mubr.f32.mxu1 %v490_v0  ;;  %v297_v0 = vld [vmem:[%s611_s5] sm:$0xff] }
 0x1e4   :  { %v282_v8 = vpop.f32.mrb[0].mxu1 }
 0x1e5   :  { %v284_v9 = vpop.f32.mrb[1].mxu1  ;;  %v283_v11 = vadd.f32 %v282_v8, %v202_v10 }
 0x1e6   :  { %v285_v13 = vadd.f32 %v284_v9, %v202_v10 }
 0x1e7   :  { %v293_v18 = vmax.f32 %v283_v11, 0.0 }
 0x1e8   :  { %v288_v14 = vpop.f32.mrb[2].mxu1  ;;  %v294_v20 = vmax.f32 %v285_v13, 0.0 }
 0x1e9   :  { %v289_v15 = vadd.f32 %v288_v14, %v207_v12  ;;  %v290_v16 = vpop.f32.mrb[3].mxu1 }
 0x1ea   :  { %v291_v17 = vadd.f32 %v290_v16, %v207_v12 }
 0x1eb   :  { %v295_v19 = vmax.f32 %v289_v15, 0.0 }
 0x1ec   :  { %v296_v21 = vmax.f32 %v291_v17, 0.0 }
 0x1ed   :  { %v429_v22 = vpack.c.bf16 %v295_v19, %v293_v18 }
 0x1ee   :  { %v427_v23 = vpack.c.bf16 %v296_v21, %v294_v20 }
 0x1f0   :  { %428 = vmatprep.subr.bf16.mxu1 %v427_v23 }
 0x1f1   :  { %430 = vmatpush1.bf16.msra.mxu1 %v429_v22 }
 0x1f4   :  { %402 = vmatmul.mubr.msk.f32.vlgmr.msra.gmra.mrb[4].mxu1 %vm304_vm2, %v297_v0 }
 0x2c7   :  { %v374_v25 = vpop.f32.mrb[4].mxu1 }
 0x2c8   :  { %v375_v26 = vadd.f32 %v374_v25, %v302_v24  ;;  %v376_v27 = vpop.f32.mrb[5].mxu1 }
 0x2c9   :  { %v377_v28 = vadd.f32 %v376_v27, %v302_v24 }
 0x2ca   :  { %379 = vst [vmem:[#allocation5] sm:$0xff] %v375_v26 }
 0x2cb   :  { %380 = vst [vmem:[#allocation5 + $0x8] sm:$0xff] %v377_v28 }
 0x2cc   :  { %472 = shalt.err (!%p469_p12)
}
 0x2cd   :  { %s473_s17 = scalar_lea.hbm %s613_s7, 256 }
 0x2ce   :  { %p474_p13 = scmp.ne.s32.totalorder %s613_s7, %s473_s17  ;;  %p477_p0 = scmp.lt.u32.totalorder %s473_s17, %s613_s7 }
 0x2d0   :  { %p479_p1 = pnand %p477_p0, %p474_p13 }
 0x2d2   :  { %482 = shalt.err (!%p479_p1)
}
 0x2d3   :  { %390 = dma.vmem_to_hbm [thread:$0]  %s388_s0, 256, %s613_s7, [#allocation4]  }
 0x2d4   :  { %485 = dma.done.wait [#allocation4], 256  }
 0x2d5   :  { %486 = vsyncadd [#allocation4], 4294967040 }
 0x2d6   :  { %394 = vsyncpa [#allocation3], 1 }
 0x2d7   :  { %395 = vsyncpa [#allocation4], 1 }

</bundles_post_ra>
